<compile_context>
chip_gen: v6e
topology: v6e:2x2x1
jax: 0.10.0
libtpu: 0.0.40
codegen_flags: <defaults>
</compile_context>

<pallas_src>
import functools
import math

import jax
import jax.numpy as jnp
from jax.experimental import pallas as pl
from jax.experimental.pallas import tpu as pltpu


# ---------------------------------------------------------------------------
# Fused kernel: QKV projection (all heads, all batch rows, one matmul) +
# per-(batch, head) scaled-dot-product attention + per-head accumulated output
# projection.  Weights stay resident in VMEM across grid steps.
# ---------------------------------------------------------------------------
def _vit_mha_kernel(num_heads, dim_q, dim_k,
                    x_ref, wqkv_ref, bqkv_ref, wo_ref, bo_ref, o_ref):
    bb, seq, dim_in = x_ref.shape
    hq = num_heads * dim_q
    hk = num_heads * dim_k
    scale = 1.0 / math.sqrt(float(dim_q))

    # Fold batch into the matmul M-dim: (bb, S, dim_in) -> (bb*S, dim_in).
    x16 = x_ref[...].reshape(bb * seq, dim_in).astype(jnp.bfloat16)

    # One fused QKV projection for all heads / all rows (bf16 MXU, f32 accum).
    qkv = (jnp.dot(x16, wqkv_ref[...], preferred_element_type=jnp.float32)
           + bqkv_ref[...])                                  # (bb*S, hq+2*hk) f32
    q_all = qkv[:, :hq] * scale                              # scale folded into q
    k_all = qkv[:, hq:hq + hk]
    v_all = qkv[:, hq + hk:]

    wo = wo_ref[...]                                         # (hk, dim_in) bf16
    bo = bo_ref[...]                                         # (1, dim_in)  f32

    # Small static loops (unrolled): attention is block-diagonal per batch
    # element, so scores cannot be folded into one M-dim matmul.
    # TODO(synk): at real ViT dims consider one masked all-head score matmul.
    for b in range(bb):
        r0 = b * seq
        acc = jnp.zeros((seq, dim_in), jnp.float32)
        for h in range(num_heads):
            cq = h * dim_q
            ck = h * dim_k
            qh = q_all[r0:r0 + seq, cq:cq + dim_q].astype(jnp.bfloat16)  # (S, dq)
            kh_t = k_all[r0:r0 + seq, ck:ck + dim_k].T.astype(jnp.bfloat16)  # (dk, S)
            vh = v_all[r0:r0 + seq, ck:ck + dim_k].astype(jnp.bfloat16)  # (S, dk)

            # Scores + softmax (f32 elementwise math).
            s = jnp.dot(qh, kh_t, preferred_element_type=jnp.float32)    # (S, S)
            s = s - jnp.max(s, axis=-1, keepdims=True)
            p = jnp.exp(s)
            p = p / jnp.sum(p, axis=-1, keepdims=True)                   # exact divide

            oh = jnp.dot(p.astype(jnp.bfloat16), vh,
                         preferred_element_type=jnp.float32)             # (S, dk)
            # Per-head output projection, accumulated (no lane concat).
            acc = acc + jnp.dot(oh.astype(jnp.bfloat16),
                                wo[ck:ck + dim_k, :],
                                preferred_element_type=jnp.float32)      # (S, dim_in)
        o_ref[b] = acc + bo


def multi_head_self_attention(packed, x, *, num_heads, dim_q, dim_k,
                              batch_block=None):
    """x: (B, S, dim_in) -> (B, S, dim_in).  Self-attention (q = k = v = x).

    batch_block=None  -> whole batch in a single grid step (best on v5e/v6e).
    batch_block=B//2  -> exactly 2 "parallel" grid steps (v7x megacore).
    """
    B, S, dim_in = x.shape
    if batch_block is None:
        batch_block = B
    if B % batch_block != 0:
        raise ValueError("batch_block must divide B")
    steps = B // batch_block

    hq = num_heads * dim_q
    hk = num_heads * dim_k
    fused = hq + 2 * hk

    x_spec = pl.BlockSpec((batch_block, S, dim_in), lambda i: (i, 0, 0))
    out_spec = pl.BlockSpec((batch_block, S, dim_in), lambda i: (i, 0, 0))
    # Constant index_maps: weights/biases DMA'd once, resident in VMEM.
    # (At real ViT-Base dims add pipeline_mode=pl.Buffered(1) to these specs to
    #  avoid double-buffering ~9 MB of resident weights.)
    wqkv_spec = pl.BlockSpec((dim_in, fused), lambda i: (0, 0))
    bqkv_spec = pl.BlockSpec((1, fused), lambda i: (0, 0))
    wo_spec = pl.BlockSpec((hk, dim_in), lambda i: (0, 0))
    bo_spec = pl.BlockSpec((1, dim_in), lambda i: (0, 0))

    kernel = functools.partial(_vit_mha_kernel, num_heads, dim_q, dim_k)

    return pl.pallas_call(
        kernel,
        out_shape=jax.ShapeDtypeStruct((B, S, dim_in), jnp.float32),
        grid_spec=pltpu.PrefetchScalarGridSpec(
            num_scalar_prefetch=0,
            grid=(steps,),
            in_specs=[x_spec, wqkv_spec, bqkv_spec, wo_spec, bo_spec],
            out_specs=out_spec,
        ),
        compiler_params=pltpu.CompilerParams(
            dimension_semantics=("parallel",),
            vmem_limit_bytes=32 * 1024 * 1024,
        ),
    )(x, packed["w_qkv"], packed["b_qkv"], packed["wo"], packed["bo"])


# ---------------------------------------------------------------------------
# Parameter init (torch.nn.Linear-style uniform +-1/sqrt(fan_in)), stored
# pre-transposed and head-fused: head h of each projection lives in columns
# [h*dim : (h+1)*dim], matching torch.cat([head_0, ..., head_{H-1}], dim=-1).
# ---------------------------------------------------------------------------
def init_mha_params(key, num_heads, dim_in, dim_q, dim_k):
    ks = jax.random.split(key, 8)

    def u(k, shape, fan_in):
        bound = 1.0 / math.sqrt(fan_in)
        return jax.random.uniform(k, shape, jnp.float32, -bound, bound)

    return {
        "wq": u(ks[0], (dim_in, num_heads * dim_q), dim_in),
        "bq": u(ks[1], (1, num_heads * dim_q), dim_in),
        "wk": u(ks[2], (dim_in, num_heads * dim_k), dim_in),
        "bk": u(ks[3], (1, num_heads * dim_k), dim_in),
        "wv": u(ks[4], (dim_in, num_heads * dim_k), dim_in),
        "bv": u(ks[5], (1, num_heads * dim_k), dim_in),
        "wo": u(ks[6], (num_heads * dim_k, dim_in), num_heads * dim_k),
        "bo": u(ks[7], (1, dim_in), num_heads * dim_k),
    }


def pack_params(params):
    """Fuse Wq|Wk|Wv and cast matmul weights to bf16 (MXU operands)."""
    return {
        "w_qkv": jnp.concatenate(
            [params["wq"], params["wk"], params["wv"]], axis=1
        ).astype(jnp.bfloat16),
        "b_qkv": jnp.concatenate(
            [params["bq"], params["bk"], params["bv"]], axis=1),    # f32
        "wo": params["wo"].astype(jnp.bfloat16),
        "bo": params["bo"],                                          # f32
    }


# ---------------------------------------------------------------------------
# Pure-JAX f32 reference for sanity checking
# ---------------------------------------------------------------------------
def _reference(params, x, num_heads, dim_q, dim_k):
    qa = x @ params["wq"] + params["bq"]
    ka = x @ params["wk"] + params["bk"]
    va = x @ params["wv"] + params["bv"]
    outs = []
    for h in range(num_heads):
        qh = qa[..., h * dim_q:(h + 1) * dim_q]
        kh = ka[..., h * dim_k:(h + 1) * dim_k]
        vh = va[..., h * dim_k:(h + 1) * dim_k]
        s = jnp.einsum("bqd,bkd->bqk", qh, kh) / math.sqrt(dim_q)
        p = jax.nn.softmax(s, axis=-1)
        outs.append(jnp.einsum("bqk,bkd->bqd", p, vh))
    cat = jnp.concatenate(outs, axis=-1)
    return cat @ params["wo"] + params["bo"]


if __name__ == "__main__":
    num_heads, dim_in, dim_q, dim_k = 4, 32, 16, 16
    B, S = 2, 8

    root = jax.random.PRNGKey(0)
    pkey, xkey = jax.random.split(root, 2)

    params = init_mha_params(pkey, num_heads, dim_in, dim_q, dim_k)
    packed = pack_params(params)
    x = jax.random.normal(xkey, (B, S, dim_in), jnp.float32)

    out = multi_head_self_attention(
        packed, x, num_heads=num_heads, dim_q=dim_q, dim_k=dim_k)
    out = jax.block_until_ready(out)

    # Exact-f32 reference; kernel uses bf16 MXU operands, hence the 5e-2 bound.
    with jax.default_matmul_precision("highest"):
        ref = _reference(params, x, num_heads, dim_q, dim_k)

    assert out.shape == (B, S, dim_in), out.shape
    max_err = float(jnp.max(jnp.abs(out - ref)))
    assert max_err < 5e-2, max_err

    print("KERNEL_OK")
</pallas_src>

<mosaic_0001>
module attributes {stable_mosaic.version = 11 : i64} {
  func.func @_vit_mha_kernel(%arg0: i32, %arg1: memref<2x8x32xf32, #tpu.memory_space<vmem>>, %arg2: memref<32x192xbf16, #tpu.memory_space<vmem>>, %arg3: memref<1x192xf32, #tpu.memory_space<vmem>>, %arg4: memref<64x32xbf16, #tpu.memory_space<vmem>>, %arg5: memref<1x32xf32, #tpu.memory_space<vmem>>, %arg6: memref<2x8x32xf32, #tpu.memory_space<vmem>>) attributes {dimension_semantics = [#tpu.dimension_semantics<parallel>], iteration_bounds = array<i64: 1>, scalar_prefetch = 0 : i64, scratch_operands = 0 : i64, tpu.core_type = #tpu.core_type<tc>, window_params = [{transform_indices = @transform_0, window_bounds = array<i64: 2, 8, 32>}, {pipeline_mode = #tpu.pipeline_mode<synchronous>, transform_indices = @transform_1, window_bounds = array<i64: 32, 192>}, {pipeline_mode = #tpu.pipeline_mode<synchronous>, transform_indices = @transform_2, window_bounds = array<i64: 1, 192>}, {pipeline_mode = #tpu.pipeline_mode<synchronous>, transform_indices = @transform_3, window_bounds = array<i64: 64, 32>}, {pipeline_mode = #tpu.pipeline_mode<synchronous>, transform_indices = @transform_4, window_bounds = array<i64: 1, 32>}, {transform_indices = @transform_5, window_bounds = array<i64: 2, 8, 32>}]} {
    %c0 = arith.constant 0 : index
    %c0_0 = arith.constant 0 : index
    %c0_1 = arith.constant 0 : index
    %0 = vector.load %arg1[%c0, %c0_0, %c0_1] : memref<2x8x32xf32, #tpu.memory_space<vmem>>, vector<2x8x32xf32>
    %1 = vector.shape_cast %0 : vector<2x8x32xf32> to vector<16x32xf32>
    %2 = arith.truncf %1 : vector<16x32xf32> to vector<16x32xbf16>
    %c0_2 = arith.constant 0 : index
    %c0_3 = arith.constant 0 : index
    %3 = vector.load %arg2[%c0_2, %c0_3] : memref<32x192xbf16, #tpu.memory_space<vmem>>, vector<32x192xbf16>
    %cst = arith.constant dense<0.000000e+00> : vector<16x192xf32>
    %4 = tpu.matmul %2, %3, %cst {dimension_numbers = #tpu.dot_dimension_numbers<[1], [0], [0], [1], [0, 0, 1, 1], [], []>} : vector<16x32xbf16>, vector<32x192xbf16>, vector<16x192xf32> -> vector<16x192xf32>
    %c0_4 = arith.constant 0 : index
    %c0_5 = arith.constant 0 : index
    %5 = vector.load %arg3[%c0_4, %c0_5] : memref<1x192xf32, #tpu.memory_space<vmem>>, vector<1x192xf32>
    %6 = vector.broadcast %5 : vector<1x192xf32> to vector<16x192xf32>
    %7 = arith.addf %4, %6 : vector<16x192xf32>
    %8 = vector.extract_strided_slice %7 {offsets = [0, 0], sizes = [16, 64], strides = [1, 1]} : vector<16x192xf32> to vector<16x64xf32>
    %cst_6 = arith.constant 2.500000e-01 : f32
    %9 = vector.broadcast %cst_6 : f32 to vector<16x64xf32>
    %10 = arith.mulf %8, %9 : vector<16x64xf32>
    %11 = vector.extract_strided_slice %7 {offsets = [0, 64], sizes = [16, 64], strides = [1, 1]} : vector<16x192xf32> to vector<16x64xf32>
    %12 = vector.extract_strided_slice %7 {offsets = [0, 128], sizes = [16, 64], strides = [1, 1]} : vector<16x192xf32> to vector<16x64xf32>
    %c0_7 = arith.constant 0 : index
    %c0_8 = arith.constant 0 : index
    %13 = vector.load %arg4[%c0_7, %c0_8] : memref<64x32xbf16, #tpu.memory_space<vmem>>, vector<64x32xbf16>
    %c0_9 = arith.constant 0 : index
    %c0_10 = arith.constant 0 : index
    %14 = vector.load %arg5[%c0_9, %c0_10] : memref<1x32xf32, #tpu.memory_space<vmem>>, vector<1x32xf32>
    %cst_11 = arith.constant 0.000000e+00 : f32
    %15 = vector.broadcast %cst_11 : f32 to vector<8x32xf32>
    %16 = vector.extract_strided_slice %10 {offsets = [0, 0], sizes = [8, 16], strides = [1, 1]} : vector<16x64xf32> to vector<8x16xf32>
    %17 = arith.truncf %16 : vector<8x16xf32> to vector<8x16xbf16>
    %18 = vector.extract_strided_slice %11 {offsets = [0, 0], sizes = [8, 16], strides = [1, 1]} : vector<16x64xf32> to vector<8x16xf32>
    %19 = tpu.transpose %18, [1, 0] : vector<8x16xf32> -> vector<16x8xf32>
    %20 = arith.truncf %19 : vector<16x8xf32> to vector<16x8xbf16>
    %21 = vector.extract_strided_slice %12 {offsets = [0, 0], sizes = [8, 16], strides = [1, 1]} : vector<16x64xf32> to vector<8x16xf32>
    %22 = arith.truncf %21 : vector<8x16xf32> to vector<8x16xbf16>
    %cst_12 = arith.constant dense<0.000000e+00> : vector<8x8xf32>
    %23 = tpu.matmul %17, %20, %cst_12 {dimension_numbers = #tpu.dot_dimension_numbers<[1], [0], [0], [1], [0, 0, 1, 1], [], []>} : vector<8x16xbf16>, vector<16x8xbf16>, vector<8x8xf32> -> vector<8x8xf32>
    %cst_13 = arith.constant dense<0xFF800000> : vector<8xf32>
    %24 = vector.multi_reduction <maximumf>, %23, %cst_13 [1] : vector<8x8xf32> to vector<8xf32>
    %25 = vector.shape_cast %24 : vector<8xf32> to vector<8x1xf32>
    %26 = vector.broadcast %25 : vector<8x1xf32> to vector<8x8xf32>
    %27 = arith.subf %23, %26 : vector<8x8xf32>
    %28 = math.exp %27 : vector<8x8xf32>
    %cst_14 = arith.constant dense<0.000000e+00> : vector<8xf32>
    %29 = vector.multi_reduction <add>, %28, %cst_14 [1] : vector<8x8xf32> to vector<8xf32>
    %30 = vector.shape_cast %29 : vector<8xf32> to vector<8x1xf32>
    %31 = vector.broadcast %30 : vector<8x1xf32> to vector<8x8xf32>
    %32 = arith.divf %28, %31 : vector<8x8xf32>
    %33 = arith.truncf %32 : vector<8x8xf32> to vector<8x8xbf16>
    %cst_15 = arith.constant dense<0.000000e+00> : vector<8x16xf32>
    %34 = tpu.matmul %33, %22, %cst_15 {dimension_numbers = #tpu.dot_dimension_numbers<[1], [0], [0], [1], [0, 0, 1, 1], [], []>} : vector<8x8xbf16>, vector<8x16xbf16>, vector<8x16xf32> -> vector<8x16xf32>
    %35 = arith.truncf %34 : vector<8x16xf32> to vector<8x16xbf16>
    %36 = vector.extract_strided_slice %13 {offsets = [0, 0], sizes = [16, 32], strides = [1, 1]} : vector<64x32xbf16> to vector<16x32xbf16>
    %cst_16 = arith.constant dense<0.000000e+00> : vector<8x32xf32>
    %37 = tpu.matmul %35, %36, %cst_16 {dimension_numbers = #tpu.dot_dimension_numbers<[1], [0], [0], [1], [0, 0, 1, 1], [], []>} : vector<8x16xbf16>, vector<16x32xbf16>, vector<8x32xf32> -> vector<8x32xf32>
    %38 = arith.addf %15, %37 : vector<8x32xf32>
    %39 = vector.extract_strided_slice %10 {offsets = [0, 16], sizes = [8, 16], strides = [1, 1]} : vector<16x64xf32> to vector<8x16xf32>
    %40 = arith.truncf %39 : vector<8x16xf32> to vector<8x16xbf16>
    %41 = vector.extract_strided_slice %11 {offsets = [0, 16], sizes = [8, 16], strides = [1, 1]} : vector<16x64xf32> to vector<8x16xf32>
    %42 = tpu.transpose %41, [1, 0] : vector<8x16xf32> -> vector<16x8xf32>
    %43 = arith.truncf %42 : vector<16x8xf32> to vector<16x8xbf16>
    %44 = vector.extract_strided_slice %12 {offsets = [0, 16], sizes = [8, 16], strides = [1, 1]} : vector<16x64xf32> to vector<8x16xf32>
    %45 = arith.truncf %44 : vector<8x16xf32> to vector<8x16xbf16>
    %cst_17 = arith.constant dense<0.000000e+00> : vector<8x8xf32>
    %46 = tpu.matmul %40, %43, %cst_17 {dimension_numbers = #tpu.dot_dimension_numbers<[1], [0], [0], [1], [0, 0, 1, 1], [], []>} : vector<8x16xbf16>, vector<16x8xbf16>, vector<8x8xf32> -> vector<8x8xf32>
    %cst_18 = arith.constant dense<0xFF800000> : vector<8xf32>
    %47 = vector.multi_reduction <maximumf>, %46, %cst_18 [1] : vector<8x8xf32> to vector<8xf32>
    %48 = vector.shape_cast %47 : vector<8xf32> to vector<8x1xf32>
    %49 = vector.broadcast %48 : vector<8x1xf32> to vector<8x8xf32>
    %50 = arith.subf %46, %49 : vector<8x8xf32>
    %51 = math.exp %50 : vector<8x8xf32>
    %cst_19 = arith.constant dense<0.000000e+00> : vector<8xf32>
    %52 = vector.multi_reduction <add>, %51, %cst_19 [1] : vector<8x8xf32> to vector<8xf32>
    %53 = vector.shape_cast %52 : vector<8xf32> to vector<8x1xf32>
    %54 = vector.broadcast %53 : vector<8x1xf32> to vector<8x8xf32>
    %55 = arith.divf %51, %54 : vector<8x8xf32>
    %56 = arith.truncf %55 : vector<8x8xf32> to vector<8x8xbf16>
    %cst_20 = arith.constant dense<0.000000e+00> : vector<8x16xf32>
    %57 = tpu.matmul %56, %45, %cst_20 {dimension_numbers = #tpu.dot_dimension_numbers<[1], [0], [0], [1], [0, 0, 1, 1], [], []>} : vector<8x8xbf16>, vector<8x16xbf16>, vector<8x16xf32> -> vector<8x16xf32>
    %58 = arith.truncf %57 : vector<8x16xf32> to vector<8x16xbf16>
    %59 = vector.extract_strided_slice %13 {offsets = [16, 0], sizes = [16, 32], strides = [1, 1]} : vector<64x32xbf16> to vector<16x32xbf16>
    %cst_21 = arith.constant dense<0.000000e+00> : vector<8x32xf32>
    %60 = tpu.matmul %58, %59, %cst_21 {dimension_numbers = #tpu.dot_dimension_numbers<[1], [0], [0], [1], [0, 0, 1, 1], [], []>} : vector<8x16xbf16>, vector<16x32xbf16>, vector<8x32xf32> -> vector<8x32xf32>
    %61 = arith.addf %38, %60 : vector<8x32xf32>
    %62 = vector.extract_strided_slice %10 {offsets = [0, 32], sizes = [8, 16], strides = [1, 1]} : vector<16x64xf32> to vector<8x16xf32>
    %63 = arith.truncf %62 : vector<8x16xf32> to vector<8x16xbf16>
    %64 = vector.extract_strided_slice %11 {offsets = [0, 32], sizes = [8, 16], strides = [1, 1]} : vector<16x64xf32> to vector<8x16xf32>
    %65 = tpu.transpose %64, [1, 0] : vector<8x16xf32> -> vector<16x8xf32>
    %66 = arith.truncf %65 : vector<16x8xf32> to vector<16x8xbf16>
    %67 = vector.extract_strided_slice %12 {offsets = [0, 32], sizes = [8, 16], strides = [1, 1]} : vector<16x64xf32> to vector<8x16xf32>
    %68 = arith.truncf %67 : vector<8x16xf32> to vector<8x16xbf16>
    %cst_22 = arith.constant dense<0.000000e+00> : vector<8x8xf32>
    %69 = tpu.matmul %63, %66, %cst_22 {dimension_numbers = #tpu.dot_dimension_numbers<[1], [0], [0], [1], [0, 0, 1, 1], [], []>} : vector<8x16xbf16>, vector<16x8xbf16>, vector<8x8xf32> -> vector<8x8xf32>
    %cst_23 = arith.constant dense<0xFF800000> : vector<8xf32>
    %70 = vector.multi_reduction <maximumf>, %69, %cst_23 [1] : vector<8x8xf32> to vector<8xf32>
    %71 = vector.shape_cast %70 : vector<8xf32> to vector<8x1xf32>
    %72 = vector.broadcast %71 : vector<8x1xf32> to vector<8x8xf32>
    %73 = arith.subf %69, %72 : vector<8x8xf32>
    %74 = math.exp %73 : vector<8x8xf32>
    %cst_24 = arith.constant dense<0.000000e+00> : vector<8xf32>
    %75 = vector.multi_reduction <add>, %74, %cst_24 [1] : vector<8x8xf32> to vector<8xf32>
    %76 = vector.shape_cast %75 : vector<8xf32> to vector<8x1xf32>
    %77 = vector.broadcast %76 : vector<8x1xf32> to vector<8x8xf32>
    %78 = arith.divf %74, %77 : vector<8x8xf32>
    %79 = arith.truncf %78 : vector<8x8xf32> to vector<8x8xbf16>
    %cst_25 = arith.constant dense<0.000000e+00> : vector<8x16xf32>
    %80 = tpu.matmul %79, %68, %cst_25 {dimension_numbers = #tpu.dot_dimension_numbers<[1], [0], [0], [1], [0, 0, 1, 1], [], []>} : vector<8x8xbf16>, vector<8x16xbf16>, vector<8x16xf32> -> vector<8x16xf32>
    %81 = arith.truncf %80 : vector<8x16xf32> to vector<8x16xbf16>
    %82 = vector.extract_strided_slice %13 {offsets = [32, 0], sizes = [16, 32], strides = [1, 1]} : vector<64x32xbf16> to vector<16x32xbf16>
    %cst_26 = arith.constant dense<0.000000e+00> : vector<8x32xf32>
    %83 = tpu.matmul %81, %82, %cst_26 {dimension_numbers = #tpu.dot_dimension_numbers<[1], [0], [0], [1], [0, 0, 1, 1], [], []>} : vector<8x16xbf16>, vector<16x32xbf16>, vector<8x32xf32> -> vector<8x32xf32>
    %84 = arith.addf %61, %83 : vector<8x32xf32>
    %85 = vector.extract_strided_slice %10 {offsets = [0, 48], sizes = [8, 16], strides = [1, 1]} : vector<16x64xf32> to vector<8x16xf32>
    %86 = arith.truncf %85 : vector<8x16xf32> to vector<8x16xbf16>
    %87 = vector.extract_strided_slice %11 {offsets = [0, 48], sizes = [8, 16], strides = [1, 1]} : vector<16x64xf32> to vector<8x16xf32>
    %88 = tpu.transpose %87, [1, 0] : vector<8x16xf32> -> vector<16x8xf32>
    %89 = arith.truncf %88 : vector<16x8xf32> to vector<16x8xbf16>
    %90 = vector.extract_strided_slice %12 {offsets = [0, 48], sizes = [8, 16], strides = [1, 1]} : vector<16x64xf32> to vector<8x16xf32>
    %91 = arith.truncf %90 : vector<8x16xf32> to vector<8x16xbf16>
    %cst_27 = arith.constant dense<0.000000e+00> : vector<8x8xf32>
    %92 = tpu.matmul %86, %89, %cst_27 {dimension_numbers = #tpu.dot_dimension_numbers<[1], [0], [0], [1], [0, 0, 1, 1], [], []>} : vector<8x16xbf16>, vector<16x8xbf16>, vector<8x8xf32> -> vector<8x8xf32>
    %cst_28 = arith.constant dense<0xFF800000> : vector<8xf32>
    %93 = vector.multi_reduction <maximumf>, %92, %cst_28 [1] : vector<8x8xf32> to vector<8xf32>
    %94 = vector.shape_cast %93 : vector<8xf32> to vector<8x1xf32>
    %95 = vector.broadcast %94 : vector<8x1xf32> to vector<8x8xf32>
    %96 = arith.subf %92, %95 : vector<8x8xf32>
    %97 = math.exp %96 : vector<8x8xf32>
    %cst_29 = arith.constant dense<0.000000e+00> : vector<8xf32>
    %98 = vector.multi_reduction <add>, %97, %cst_29 [1] : vector<8x8xf32> to vector<8xf32>
    %99 = vector.shape_cast %98 : vector<8xf32> to vector<8x1xf32>
    %100 = vector.broadcast %99 : vector<8x1xf32> to vector<8x8xf32>
    %101 = arith.divf %97, %100 : vector<8x8xf32>
    %102 = arith.truncf %101 : vector<8x8xf32> to vector<8x8xbf16>
    %cst_30 = arith.constant dense<0.000000e+00> : vector<8x16xf32>
    %103 = tpu.matmul %102, %91, %cst_30 {dimension_numbers = #tpu.dot_dimension_numbers<[1], [0], [0], [1], [0, 0, 1, 1], [], []>} : vector<8x8xbf16>, vector<8x16xbf16>, vector<8x16xf32> -> vector<8x16xf32>
    %104 = arith.truncf %103 : vector<8x16xf32> to vector<8x16xbf16>
    %105 = vector.extract_strided_slice %13 {offsets = [48, 0], sizes = [16, 32], strides = [1, 1]} : vector<64x32xbf16> to vector<16x32xbf16>
    %cst_31 = arith.constant dense<0.000000e+00> : vector<8x32xf32>
    %106 = tpu.matmul %104, %105, %cst_31 {dimension_numbers = #tpu.dot_dimension_numbers<[1], [0], [0], [1], [0, 0, 1, 1], [], []>} : vector<8x16xbf16>, vector<16x32xbf16>, vector<8x32xf32> -> vector<8x32xf32>
    %107 = arith.addf %84, %106 : vector<8x32xf32>
    %108 = vector.broadcast %14 : vector<1x32xf32> to vector<8x32xf32>
    %109 = arith.addf %107, %108 : vector<8x32xf32>
    %c0_32 = arith.constant 0 : index
    %c0_33 = arith.constant 0 : index
    %c0_34 = arith.constant 0 : index
    %110 = vector.load %arg6[%c0_32, %c0_33, %c0_34] : memref<2x8x32xf32, #tpu.memory_space<vmem>>, vector<1x8x32xf32>
    %111 = vector.shape_cast %110 : vector<1x8x32xf32> to vector<8x32xf32>
    %112 = vector.shape_cast %109 : vector<8x32xf32> to vector<1x8x32xf32>
    tpu.vector_store %arg6[%c0_32, %c0_33, %c0_34], %112 {strides = array<i32>} : memref<2x8x32xf32, #tpu.memory_space<vmem>>, vector<1x8x32xf32>,
    %cst_35 = arith.constant 0.000000e+00 : f32
    %113 = vector.broadcast %cst_35 : f32 to vector<8x32xf32>
    %114 = vector.extract_strided_slice %10 {offsets = [8, 0], sizes = [8, 16], strides = [1, 1]} : vector<16x64xf32> to vector<8x16xf32>
    %115 = arith.truncf %114 : vector<8x16xf32> to vector<8x16xbf16>
    %116 = vector.extract_strided_slice %11 {offsets = [8, 0], sizes = [8, 16], strides = [1, 1]} : vector<16x64xf32> to vector<8x16xf32>
    %117 = tpu.transpose %116, [1, 0] : vector<8x16xf32> -> vector<16x8xf32>
    %118 = arith.truncf %117 : vector<16x8xf32> to vector<16x8xbf16>
    %119 = vector.extract_strided_slice %12 {offsets = [8, 0], sizes = [8, 16], strides = [1, 1]} : vector<16x64xf32> to vector<8x16xf32>
    %120 = arith.truncf %119 : vector<8x16xf32> to vector<8x16xbf16>
    %cst_36 = arith.constant dense<0.000000e+00> : vector<8x8xf32>
    %121 = tpu.matmul %115, %118, %cst_36 {dimension_numbers = #tpu.dot_dimension_numbers<[1], [0], [0], [1], [0, 0, 1, 1], [], []>} : vector<8x16xbf16>, vector<16x8xbf16>, vector<8x8xf32> -> vector<8x8xf32>
    %cst_37 = arith.constant dense<0xFF800000> : vector<8xf32>
    %122 = vector.multi_reduction <maximumf>, %121, %cst_37 [1] : vector<8x8xf32> to vector<8xf32>
    %123 = vector.shape_cast %122 : vector<8xf32> to vector<8x1xf32>
    %124 = vector.broadcast %123 : vector<8x1xf32> to vector<8x8xf32>
    %125 = arith.subf %121, %124 : vector<8x8xf32>
    %126 = math.exp %125 : vector<8x8xf32>
    %cst_38 = arith.constant dense<0.000000e+00> : vector<8xf32>
    %127 = vector.multi_reduction <add>, %126, %cst_38 [1] : vector<8x8xf32> to vector<8xf32>
    %128 = vector.shape_cast %127 : vector<8xf32> to vector<8x1xf32>
    %129 = vector.broadcast %128 : vector<8x1xf32> to vector<8x8xf32>
    %130 = arith.divf %126, %129 : vector<8x8xf32>
    %131 = arith.truncf %130 : vector<8x8xf32> to vector<8x8xbf16>
    %cst_39 = arith.constant dense<0.000000e+00> : vector<8x16xf32>
    %132 = tpu.matmul %131, %120, %cst_39 {dimension_numbers = #tpu.dot_dimension_numbers<[1], [0], [0], [1], [0, 0, 1, 1], [], []>} : vector<8x8xbf16>, vector<8x16xbf16>, vector<8x16xf32> -> vector<8x16xf32>
    %133 = arith.truncf %132 : vector<8x16xf32> to vector<8x16xbf16>
    %134 = vector.extract_strided_slice %13 {offsets = [0, 0], sizes = [16, 32], strides = [1, 1]} : vector<64x32xbf16> to vector<16x32xbf16>
    %cst_40 = arith.constant dense<0.000000e+00> : vector<8x32xf32>
    %135 = tpu.matmul %133, %134, %cst_40 {dimension_numbers = #tpu.dot_dimension_numbers<[1], [0], [0], [1], [0, 0, 1, 1], [], []>} : vector<8x16xbf16>, vector<16x32xbf16>, vector<8x32xf32> -> vector<8x32xf32>
    %136 = arith.addf %113, %135 : vector<8x32xf32>
    %137 = vector.extract_strided_slice %10 {offsets = [8, 16], sizes = [8, 16], strides = [1, 1]} : vector<16x64xf32> to vector<8x16xf32>
    %138 = arith.truncf %137 : vector<8x16xf32> to vector<8x16xbf16>
    %139 = vector.extract_strided_slice %11 {offsets = [8, 16], sizes = [8, 16], strides = [1, 1]} : vector<16x64xf32> to vector<8x16xf32>
    %140 = tpu.transpose %139, [1, 0] : vector<8x16xf32> -> vector<16x8xf32>
    %141 = arith.truncf %140 : vector<16x8xf32> to vector<16x8xbf16>
    %142 = vector.extract_strided_slice %12 {offsets = [8, 16], sizes = [8, 16], strides = [1, 1]} : vector<16x64xf32> to vector<8x16xf32>
    %143 = arith.truncf %142 : vector<8x16xf32> to vector<8x16xbf16>
    %cst_41 = arith.constant dense<0.000000e+00> : vector<8x8xf32>
    %144 = tpu.matmul %138, %141, %cst_41 {dimension_numbers = #tpu.dot_dimension_numbers<[1], [0], [0], [1], [0, 0, 1, 1], [], []>} : vector<8x16xbf16>, vector<16x8xbf16>, vector<8x8xf32> -> vector<8x8xf32>
    %cst_42 = arith.constant dense<0xFF800000> : vector<8xf32>
    %145 = vector.multi_reduction <maximumf>, %144, %cst_42 [1] : vector<8x8xf32> to vector<8xf32>
    %146 = vector.shape_cast %145 : vector<8xf32> to vector<8x1xf32>
    %147 = vector.broadcast %146 : vector<8x1xf32> to vector<8x8xf32>
    %148 = arith.subf %144, %147 : vector<8x8xf32>
    %149 = math.exp %148 : vector<8x8xf32>
    %cst_43 = arith.constant dense<0.000000e+00> : vector<8xf32>
    %150 = vector.multi_reduction <add>, %149, %cst_43 [1] : vector<8x8xf32> to vector<8xf32>
    %151 = vector.shape_cast %150 : vector<8xf32> to vector<8x1xf32>
    %152 = vector.broadcast %151 : vector<8x1xf32> to vector<8x8xf32>
    %153 = arith.divf %149, %152 : vector<8x8xf32>
    %154 = arith.truncf %153 : vector<8x8xf32> to vector<8x8xbf16>
    %cst_44 = arith.constant dense<0.000000e+00> : vector<8x16xf32>
    %155 = tpu.matmul %154, %143, %cst_44 {dimension_numbers = #tpu.dot_dimension_numbers<[1], [0], [0], [1], [0, 0, 1, 1], [], []>} : vector<8x8xbf16>, vector<8x16xbf16>, vector<8x16xf32> -> vector<8x16xf32>
    %156 = arith.truncf %155 : vector<8x16xf32> to vector<8x16xbf16>
    %157 = vector.extract_strided_slice %13 {offsets = [16, 0], sizes = [16, 32], strides = [1, 1]} : vector<64x32xbf16> to vector<16x32xbf16>
    %cst_45 = arith.constant dense<0.000000e+00> : vector<8x32xf32>
    %158 = tpu.matmul %156, %157, %cst_45 {dimension_numbers = #tpu.dot_dimension_numbers<[1], [0], [0], [1], [0, 0, 1, 1], [], []>} : vector<8x16xbf16>, vector<16x32xbf16>, vector<8x32xf32> -> vector<8x32xf32>
    %159 = arith.addf %136, %158 : vector<8x32xf32>
    %160 = vector.extract_strided_slice %10 {offsets = [8, 32], sizes = [8, 16], strides = [1, 1]} : vector<16x64xf32> to vector<8x16xf32>
    %161 = arith.truncf %160 : vector<8x16xf32> to vector<8x16xbf16>
    %162 = vector.extract_strided_slice %11 {offsets = [8, 32], sizes = [8, 16], strides = [1, 1]} : vector<16x64xf32> to vector<8x16xf32>
    %163 = tpu.transpose %162, [1, 0] : vector<8x16xf32> -> vector<16x8xf32>
    %164 = arith.truncf %163 : vector<16x8xf32> to vector<16x8xbf16>
    %165 = vector.extract_strided_slice %12 {offsets = [8, 32], sizes = [8, 16], strides = [1, 1]} : vector<16x64xf32> to vector<8x16xf32>
    %166 = arith.truncf %165 : vector<8x16xf32> to vector<8x16xbf16>
    %cst_46 = arith.constant dense<0.000000e+00> : vector<8x8xf32>
    %167 = tpu.matmul %161, %164, %cst_46 {dimension_numbers = #tpu.dot_dimension_numbers<[1], [0], [0], [1], [0, 0, 1, 1], [], []>} : vector<8x16xbf16>, vector<16x8xbf16>, vector<8x8xf32> -> vector<8x8xf32>
    %cst_47 = arith.constant dense<0xFF800000> : vector<8xf32>
    %168 = vector.multi_reduction <maximumf>, %167, %cst_47 [1] : vector<8x8xf32> to vector<8xf32>
    %169 = vector.shape_cast %168 : vector<8xf32> to vector<8x1xf32>
    %170 = vector.broadcast %169 : vector<8x1xf32> to vector<8x8xf32>
    %171 = arith.subf %167, %170 : vector<8x8xf32>
    %172 = math.exp %171 : vector<8x8xf32>
    %cst_48 = arith.constant dense<0.000000e+00> : vector<8xf32>
    %173 = vector.multi_reduction <add>, %172, %cst_48 [1] : vector<8x8xf32> to vector<8xf32>
    %174 = vector.shape_cast %173 : vector<8xf32> to vector<8x1xf32>
    %175 = vector.broadcast %174 : vector<8x1xf32> to vector<8x8xf32>
    %176 = arith.divf %172, %175 : vector<8x8xf32>
    %177 = arith.truncf %176 : vector<8x8xf32> to vector<8x8xbf16>
    %cst_49 = arith.constant dense<0.000000e+00> : vector<8x16xf32>
    %178 = tpu.matmul %177, %166, %cst_49 {dimension_numbers = #tpu.dot_dimension_numbers<[1], [0], [0], [1], [0, 0, 1, 1], [], []>} : vector<8x8xbf16>, vector<8x16xbf16>, vector<8x16xf32> -> vector<8x16xf32>
    %179 = arith.truncf %178 : vector<8x16xf32> to vector<8x16xbf16>
    %180 = vector.extract_strided_slice %13 {offsets = [32, 0], sizes = [16, 32], strides = [1, 1]} : vector<64x32xbf16> to vector<16x32xbf16>
    %cst_50 = arith.constant dense<0.000000e+00> : vector<8x32xf32>
    %181 = tpu.matmul %179, %180, %cst_50 {dimension_numbers = #tpu.dot_dimension_numbers<[1], [0], [0], [1], [0, 0, 1, 1], [], []>} : vector<8x16xbf16>, vector<16x32xbf16>, vector<8x32xf32> -> vector<8x32xf32>
    %182 = arith.addf %159, %181 : vector<8x32xf32>
    %183 = vector.extract_strided_slice %10 {offsets = [8, 48], sizes = [8, 16], strides = [1, 1]} : vector<16x64xf32> to vector<8x16xf32>
    %184 = arith.truncf %183 : vector<8x16xf32> to vector<8x16xbf16>
    %185 = vector.extract_strided_slice %11 {offsets = [8, 48], sizes = [8, 16], strides = [1, 1]} : vector<16x64xf32> to vector<8x16xf32>
    %186 = tpu.transpose %185, [1, 0] : vector<8x16xf32> -> vector<16x8xf32>
    %187 = arith.truncf %186 : vector<16x8xf32> to vector<16x8xbf16>
    %188 = vector.extract_strided_slice %12 {offsets = [8, 48], sizes = [8, 16], strides = [1, 1]} : vector<16x64xf32> to vector<8x16xf32>
    %189 = arith.truncf %188 : vector<8x16xf32> to vector<8x16xbf16>
    %cst_51 = arith.constant dense<0.000000e+00> : vector<8x8xf32>
    %190 = tpu.matmul %184, %187, %cst_51 {dimension_numbers = #tpu.dot_dimension_numbers<[1], [0], [0], [1], [0, 0, 1, 1], [], []>} : vector<8x16xbf16>, vector<16x8xbf16>, vector<8x8xf32> -> vector<8x8xf32>
    %cst_52 = arith.constant dense<0xFF800000> : vector<8xf32>
    %191 = vector.multi_reduction <maximumf>, %190, %cst_52 [1] : vector<8x8xf32> to vector<8xf32>
    %192 = vector.shape_cast %191 : vector<8xf32> to vector<8x1xf32>
    %193 = vector.broadcast %192 : vector<8x1xf32> to vector<8x8xf32>
    %194 = arith.subf %190, %193 : vector<8x8xf32>
    %195 = math.exp %194 : vector<8x8xf32>
    %cst_53 = arith.constant dense<0.000000e+00> : vector<8xf32>
    %196 = vector.multi_reduction <add>, %195, %cst_53 [1] : vector<8x8xf32> to vector<8xf32>
    %197 = vector.shape_cast %196 : vector<8xf32> to vector<8x1xf32>
    %198 = vector.broadcast %197 : vector<8x1xf32> to vector<8x8xf32>
    %199 = arith.divf %195, %198 : vector<8x8xf32>
    %200 = arith.truncf %199 : vector<8x8xf32> to vector<8x8xbf16>
    %cst_54 = arith.constant dense<0.000000e+00> : vector<8x16xf32>
    %201 = tpu.matmul %200, %189, %cst_54 {dimension_numbers = #tpu.dot_dimension_numbers<[1], [0], [0], [1], [0, 0, 1, 1], [], []>} : vector<8x8xbf16>, vector<8x16xbf16>, vector<8x16xf32> -> vector<8x16xf32>
    %202 = arith.truncf %201 : vector<8x16xf32> to vector<8x16xbf16>
    %203 = vector.extract_strided_slice %13 {offsets = [48, 0], sizes = [16, 32], strides = [1, 1]} : vector<64x32xbf16> to vector<16x32xbf16>
    %cst_55 = arith.constant dense<0.000000e+00> : vector<8x32xf32>
    %204 = tpu.matmul %202, %203, %cst_55 {dimension_numbers = #tpu.dot_dimension_numbers<[1], [0], [0], [1], [0, 0, 1, 1], [], []>} : vector<8x16xbf16>, vector<16x32xbf16>, vector<8x32xf32> -> vector<8x32xf32>
    %205 = arith.addf %182, %204 : vector<8x32xf32>
    %206 = vector.broadcast %14 : vector<1x32xf32> to vector<8x32xf32>
    %207 = arith.addf %205, %206 : vector<8x32xf32>
    %c1 = arith.constant 1 : index
    %c0_56 = arith.constant 0 : index
    %c0_57 = arith.constant 0 : index
    %208 = vector.load %arg6[%c1, %c0_56, %c0_57] : memref<2x8x32xf32, #tpu.memory_space<vmem>>, vector<1x8x32xf32>
    %209 = vector.shape_cast %208 : vector<1x8x32xf32> to vector<8x32xf32>
    %210 = vector.shape_cast %207 : vector<8x32xf32> to vector<1x8x32xf32>
    tpu.vector_store %arg6[%c1, %c0_56, %c0_57], %210 {strides = array<i32>} : memref<2x8x32xf32, #tpu.memory_space<vmem>>, vector<1x8x32xf32>,
    return
  }
  func.func @transform_0(%arg0: i32) -> (i32, i32, i32) {
    %c0_i32 = arith.constant 0 : i32
    %c0_i32_0 = arith.constant 0 : i32
    %c0_i32_1 = arith.constant 0 : i32
    return %arg0, %c0_i32, %c0_i32_0 : i32, i32, i32
  }
  func.func @transform_1(%arg0: i32) -> (i32, i32) {
    %c0_i32 = arith.constant 0 : i32
    %c0_i32_0 = arith.constant 0 : i32
    %c0_i32_1 = arith.constant 0 : i32
    return %c0_i32, %c0_i32_0 : i32, i32
  }
  func.func @transform_2(%arg0: i32) -> (i32, i32) {
    %c0_i32 = arith.constant 0 : i32
    %c0_i32_0 = arith.constant 0 : i32
    %c0_i32_1 = arith.constant 0 : i32
    return %c0_i32, %c0_i32_0 : i32, i32
  }
  func.func @transform_3(%arg0: i32) -> (i32, i32) {
    %c0_i32 = arith.constant 0 : i32
    %c0_i32_0 = arith.constant 0 : i32
    %c0_i32_1 = arith.constant 0 : i32
    return %c0_i32, %c0_i32_0 : i32, i32
  }
  func.func @transform_4(%arg0: i32) -> (i32, i32) {
    %c0_i32 = arith.constant 0 : i32
    %c0_i32_0 = arith.constant 0 : i32
    %c0_i32_1 = arith.constant 0 : i32
    return %c0_i32, %c0_i32_0 : i32, i32
  }
  func.func @transform_5(%arg0: i32) -> (i32, i32, i32) {
    %c0_i32 = arith.constant 0 : i32
    %c0_i32_0 = arith.constant 0 : i32
    %c0_i32_1 = arith.constant 0 : i32
    return %arg0, %c0_i32, %c0_i32_0 : i32, i32, i32
  }
}

</mosaic_0001>

<bundles_post_ra>
// kernel: tpu_custom_call.1
= control target key start
LH: loop header
LB: loop body
LE: loop exit
PB: predicated region body
PF: predicated region fallthrough
CT: control target
= control target key end

     0   :  { %v1962_v2 = vmov 0   ;;  %s2261_s0 = inlined_call_operand.vmem [shape: f32[2,8,32], index: 0, kind: input, shape index: {}]   ;;  %s2262_s1 = inlined_call_operand.vmem [shape: bf16[32,192], index: 1, kind: input, shape index: {}]   ;;  %s2263_s2 = inlined_call_operand.vmem [shape: f32[1,192], index: 2, kind: input, shape index: {}]   ;;  %s2264_s3 = inlined_call_operand.vmem [shape: bf16[64,32], index: 3, kind: input, shape index: {}]   ;;  %s2265_s4 = inlined_call_operand.vmem [shape: f32[1,32], index: 4, kind: input, shape index: {}]   ;;  %s2266_s5 = inlined_call_operand.hbm [shape: f32[2,8,32], index: 5, kind: output, shape index: {}]  }
   0x1   :  { %v1898_v0 = vld [vmem:[%s2262_s1 + $0x14] ss:$8 sps:$4 sm:$0xff]   ;;  %v1900_v1 = vld [vmem:[%s2262_s1 + $0x10] ss:$8 sps:$4 sm:$0xff]   ;;  %97 = vmatprep.mubr.bf16.mxu0 %v1962_v2  ;;  %v1901_v3 = vld [vmem:[%s2262_s1 + $0x4] ss:$8 sps:$4 sm:$0xff]  }
   0x2   :  { %77 = vmatprep.subr.bf16.mxu0 %v1898_v0  ;;  %v1903_v4 = vld [vmem:[%s2262_s1] ss:$8 sps:$4 sm:$0xff]  }
   0x3   :  { %78 = vmatpush1.bf16.msra.mxu0 %v1900_v1  ;;  %v22_v5 = vld [vmem:[%s2261_s0] sm:$0xff]  ;;  %v23_v6 = vld [vmem:[%s2261_s0 + $0x8] sm:$0xff] }
   0x4   :  { %79 = vmatprep.subr.bf16.mxu0 %v1901_v3  ;;  %v24_v7 = vpack.c.bf16 %v23_v6, %v22_v5 }
   0x5   :  { %10 = vsyncpa [#allocation3], 0  ;;  %vm61_vm0 = vcmask 261120   ;;  %v31_v8 = vlaneseq  ;;  %v29_v11 = vld [vmem:[%s2263_s2] sm:$0x3]  ;;  %s1963_s0 = smov 64  }
   0x6   :  { %s1964_s6 = smov 48   ;;  %s1965_s2 = smov 112   ;;  %v1966_v21 = vmov 0.0   ;;  %vm1967_vm1 = vmmov 0   ;;  %vm158_vm2 = vcmask 130048   ;;  %vm218_vm3 = vcmask 1043456  }
   0x7   :  { %80 = vmatpush1.bf16.msra.mxu0 %v1903_v4  ;;  %v32_v9 = vshrl.u32 %v31_v8, 7  ;;  %1741 = vmatprep.subr.bf16.mxu1 %v1966_v21  ;;  %vm202_vm4 = vcmask 64512   ;;  %s1968_s7 = smov 32   ;;  %s1969_s8 = smov 96   ;;  %v2088_v3 = vld [vmem:[%s2264_s3] sm:$0xff]   ;;  %v2095_v4 = vld [vmem:[%s2264_s3 + $0x8] sm:$0xff]  }
   0x8   :  { %1753 = vmatprep.subr.bf16.mxu0 %v1966_v21  ;;  %1743 = vmatprep.mubr.msk.bf16.mxu1 %vm1967_vm1, %v1966_v21  ;;  %s1970_s9 = smov 16   ;;  %s1971_s14 = smov 80  }
   0x9   :  { %v33_v10 = vsub.s32 0, %v32_v9  ;;  %v37_v23 = vsub.s32 1, %v32_v9 }
   0xa   :  { %1663 = vmatmul.mubr.msk.bf16.vlgmr.msra.gmra.mxu0 %vm61_vm0, %v24_v7 }
   0xb   :  { %v34_v12 = vrot.slane %v29_v11, %v33_v10  ;;  %1755 = vmatprep.mubr.msk.bf16.mxu0 %vm1967_vm1, %v1966_v21  ;;  %v2046_v25 = vrot.slane %v29_v11, %v37_v23 }
  0xca   :  { %v99_v13 = vpop.f32.mrf.mxu0 }
  0xcb   :  { %v2027_v14 = vadd.f32 %v99_v13, %v34_v12 }
  0xcc   :  { %v101_v15 = vpop.f32.mrf.mxu0 }
  0xcd   :  { %121 = vrot.lane.b32.xlu0 %v2027_v14, %s1963_s0  ;;  %v108_v16 = vmul.f32 0.25, %v2027_v14  ;;  %v102_v27 = vadd.f32 %v101_v15, %v2046_v25 }
  0xce   :  { %v103_v17 = vpop.f32.mrf.mxu0 }
  0xcf   :  { %v2032_v18 = vadd.f32 %v103_v17, %v34_v12  ;;  %v2034_v19 = vpack.c.bf16 %v108_v16, %v108_v16  ;;  %v2049_v31 = vpack.c.bf16 %v102_v27, %v102_v27 }
  0xd0   :  { %v2064_v37 = vpop.f32.mrf.mxu0 }
  0xd1   :  { %263 = vrot.lane.b32.xlu0 %v2027_v14, %s1964_s6  ;;  %300 = vrot.lane.b32.xlu1 %v2034_v19, %s1965_s2  ;;  %v220_v34 = vsel %vm218_vm3, %v2049_v31, 0 }
 0x13f   :  { %v122_v20 = vpop.permute.xlu0 %121 }
 0x140   :  { %124 = vxpose.xlu1.b32.start.end [1/1] (short) (narrow) %v122_v20, 16 }
 0x143   :  { %v264_v22 = vpop.permute.xlu0 %263  ;;  %v301_v24 = vpop.permute.xlu1 %300 }
 0x144   :  { %266 = vxpose.xlu0.b32.start.end [1/1] (short) (narrow) %v264_v22, 16 }
 0x1bc   :  { %v140_v26 = vpop.trf.xlu1 }
 0x1c0   :  { %v282_v28 = vpop.trf.xlu0  ;;  %v141_v29 = vpop.trf.xlu1 }
 0x1c1   :  { %v156_v30 = vpack.c.bf16 %v141_v29, %v140_v26 }
 0x1c3   :  { %1742 = vmatpush3.bf16.msra.mxu1 %v156_v30 }
 0x1c4   :  { %v283_v32 = vpop.trf.xlu0  ;;  %1747 = vmatprep.subr.bf16.mxu1 %v1966_v21 }
 0x1c5   :  { %v298_v33 = vpack.c.bf16 %v283_v32, %v282_v28 }
 0x1c6   :  { %1744 = vmatmul.mubr.msk.bf16.vlgmr.msra.gmra.mxu1 %vm158_vm2, %v2034_v19 }
 0x1c7   :  { %1748 = vmatpush3.bf16.msra.mxu1 %v220_v34  ;;  %1754 = vmatpush3.bf16.msra.mxu0 %v298_v33 }
 0x1c8   :  { %1749 = vmatprep.mubr.msk.bf16.mxu1 %vm1967_vm1, %v1966_v21  ;;  %1759 = vmatprep.subr.bf16.mxu1 %v1966_v21 }
 0x1c9   :  { %1765 = vmatprep.subr.bf16.mxu0 %v1966_v21 }
 0x1ca   :  { %1756 = vmatmul.mubr.msk.bf16.vlgmr.msra.gmra.mxu0 %vm158_vm2, %v301_v24 }
 0x1cb   :  { %1767 = vmatprep.mubr.msk.bf16.mxu0 %vm1967_vm1, %v1966_v21  ;;  %1766 = vmatpush3.bf16.msra.mxu0 %v2095_v4 }
 0x1cc   :  { %1777 = vmatprep.subr.bf16.mxu0 %v1966_v21 }
 0x286   :  { %v196_v35 = vpop.f32.mrf.mxu1 }
 0x287   :  { %v203_v36 = vsel %vm202_vm4, %v196_v35, -inf }
 0x288   :  { %204 = vmax.xlane.f32.xlu0 %v203_v36  ;;  %v1745_v38 = vpop.f32.mrf.mxu1 }
 0x28a   :  { %v199_v39 = vpop.f32.mrf.mxu1  ;;  %v339_v40 = vpop.f32.mrf.mxu0 }
 0x28b   :  { %v345_v41 = vsel %vm202_vm4, %v339_v40, -inf }
 0x28c   :  { %346 = vmax.xlane.f32.xlu1 %v345_v41  ;;  %v1746_v42 = vpop.f32.mrf.mxu1  ;;  %v1757_v43 = vpop.f32.mrf.mxu0 }
 0x28e   :  { %v342_v44 = vpop.f32.mrf.mxu0 }
 0x290   :  { %v1758_v45 = vpop.f32.mrf.mxu0 }
 0x311   :  { %v205_v46 = vpop.xlane.xlu0 %204 }
 0x312   :  { %v206_v47 = vsub.f32 %v196_v35, %v205_v46 }
 0x314   :  { %v207_v48 = vmul.f32 1.442695, %v206_v47 }
 0x315   :  { %v347_v49 = vpop.xlane.xlu1 %346 }
 0x316   :  { %1908 = vpow2.f32 %v207_v48  ;;  %v348_v50 = vsub.f32 %v339_v40, %v347_v49 }
 0x318   :  { %v349_v51 = vmul.f32 1.442695, %v348_v50 }
 0x31a   :  { %1910 = vpow2.f32 %v349_v51 }
 0x323   :  { %v1909_v52 = vpop.eup %1908 }
 0x324   :  { %v209_v53 = vsel %vm202_vm4, %v1909_v52, 0.0 }
 0x325   :  { %210 = vadd.xlane.f32.xlu0 %v209_v53 }
 0x327   :  { %v1911_v54 = vpop.eup %1910 }
 0x328   :  { %v351_v55 = vsel %vm202_vm4, %v1911_v54, 0.0 }
 0x329   :  { %352 = vadd.xlane.f32.xlu1 %v351_v55  ;;  %v2131_v55 = vld [vmem:[%s2264_s3 + $0x10] sm:$0xff]  }
 0x33a   :  { %505 = vrot.lane.b32.xlu1 %v2027_v14, %s1968_s7 }
 0x33b   :  { %358 = vrot.lane.b32.xlu0 %v2049_v31, %s1965_s2 }
 0x33e   :  { %541 = vrot.lane.b32.xlu1 %v2034_v19, %s1969_s8 }
 0x3ae   :  { %v211_v56 = vpop.xlane.xlu0 %210 }
 0x3af   :  { %1912 = vrcp.f32 %v211_v56 }
 0x3b2   :  { %v353_v57 = vpop.xlane.xlu1 %352  ;;  %v359_v61 = vpop.permute.xlu0 %358 }
 0x3b3   :  { %1914 = vrcp.f32 %v353_v57  ;;  %v364_v0 = vsel %vm218_vm3, %v359_v61, 0 }
 0x3b6   :  { %v506_v58 = vpop.permute.xlu1 %505 }
 0x3b7   :  { %508 = vxpose.xlu0.b32.start.end [1/1] (short) (narrow) %v506_v58, 16 }
 0x3ba   :  { %v542_v20 = vpop.permute.xlu1 %541 }
 0x3bc   :  { %v1913_v59 = vpop.eup %1912 }
 0x3bd   :  { %v213_v60 = vmul.f32 %v1913_v59, %v1909_v52 }
 0x3bf   :  { %v214_v62 = vpack.c.bf16 %v213_v60, %v213_v60 }
 0x3c0   :  { %v1915_v63 = vpop.eup %1914 }
 0x3c1   :  { %1750 = vmatmul.mubr.msk.bf16.vlgmr.msra.gmra.mxu1 %vm202_vm4, %v214_v62  ;;  %v355_v1 = vmul.f32 %v1915_v63, %v1911_v54 }
 0x3c2   :  { %1760 = vmatpush3.bf16.msra.mxu1 %v364_v0  ;;  %1761 = vmatprep.mubr.msk.bf16.mxu1 %vm1967_vm1, %v1966_v21 }
 0x3c3   :  { %1771 = vmatprep.subr.bf16.mxu1 %v1966_v21  ;;  %v356_v2 = vpack.c.bf16 %v355_v1, %v355_v1 }
 0x3c9   :  { %1762 = vmatmul.mubr.msk.bf16.vlgmr.msra.gmra.mxu1 %vm202_vm4, %v356_v2 }
 0x3ca   :  { %1773 = vmatprep.mubr.msk.bf16.mxu1 %vm1967_vm1, %v1966_v21  ;;  %1772 = vmatpush3.bf16.msra.mxu1 %v2088_v3 }
 0x3cb   :  { %1783 = vmatprep.subr.bf16.mxu1 %v1966_v21 }
 0x3e4   :  { %697 = vrot.lane.b32.xlu0 %v2027_v14, %s1970_s9 }
 0x433   :  { %v524_v6 = vpop.trf.xlu0 }
 0x437   :  { %v525_v11 = vpop.trf.xlu0 }
 0x438   :  { %v540_v12 = vpack.c.bf16 %v525_v11, %v524_v6 }
 0x456   :  { %v698_v46 = vpop.permute.xlu0 %697 }
 0x481   :  { %v256_v5 = vpop.f32.mrf.mxu1 }
 0x482   :  { %v262_v7 = vpack.c.bf16 %v256_v5, %v256_v5 }
 0x483   :  { %v1751_v8 = vpop.f32.mrf.mxu1 }
 0x484   :  { %1774 = vmatmul.mubr.msk.bf16.vlgmr.msra.gmra.mxu1 %vm158_vm2, %v262_v7 }
 0x485   :  { %v259_v9 = vpop.f32.mrf.mxu1  ;;  %1785 = vmatprep.mubr.msk.bf16.mxu1 %vm1967_vm1, %v1966_v21 }
 0x487   :  { %v1752_v10 = vpop.f32.mrf.mxu1 }
 0x489   :  { %v400_v13 = vpop.f32.mrf.mxu1 }
 0x48a   :  { %v406_v14 = vpack.c.bf16 %v400_v13, %v400_v13 }
 0x48b   :  { %v1763_v15 = vpop.f32.mrf.mxu1 }
 0x48c   :  { %1768 = vmatmul.mubr.msk.bf16.vlgmr.msra.gmra.mxu0 %vm158_vm2, %v406_v14  ;;  %v109_v14 = vmul.f32 0.25, %v2032_v18 }
 0x48d   :  { %v403_v16 = vpop.f32.mrf.mxu1  ;;  %1778 = vmatpush3.bf16.msra.mxu0 %v540_v12  ;;  %1779 = vmatprep.mubr.msk.bf16.mxu0 %vm1967_vm1, %v1966_v21 }
 0x48e   :  { %1789 = vmatprep.subr.bf16.mxu0 %v1966_v21  ;;  %v2148_v15 = vpack.c.bf16 %v109_v14, %v109_v14 }
 0x48f   :  { %v1764_v17 = vpop.f32.mrf.mxu1 }
 0x490   :  { %v2155_v17 = vld [vmem:[%s2264_s3 + $0x18] sm:$0xff]  }
 0x494   :  { %1780 = vmatmul.mubr.msk.bf16.vlgmr.msra.gmra.mxu0 %vm158_vm2, %v542_v20 }
 0x495   :  { %1791 = vmatprep.mubr.msk.bf16.mxu0 %vm1967_vm1, %v1966_v21  ;;  %1790 = vmatpush3.bf16.msra.mxu0 %v2131_v55 }
 0x496   :  { %1801 = vmatprep.subr.bf16.mxu0 %v1966_v21 }
 0x544   :  { %v499_v22 = vpop.f32.mrf.mxu1 }
 0x546   :  { %v1775_v23 = vpop.f32.mrf.mxu1 }
 0x548   :  { %v502_v24 = vpop.f32.mrf.mxu1 }
 0x54a   :  { %v1776_v26 = vpop.f32.mrf.mxu1 }
 0x54c   :  { %v450_v27 = vpop.f32.mrf.mxu0 }
 0x54d   :  { %v2109_v28 = vadd.f32 %v499_v22, %v450_v27 }
 0x54e   :  { %v1769_v29 = vpop.f32.mrf.mxu0 }
 0x550   :  { %v453_v30 = vpop.f32.mrf.mxu0 }
 0x552   :  { %v1770_v32 = vpop.f32.mrf.mxu0 }
 0x554   :  { %v580_v33 = vpop.f32.mrf.mxu0 }
 0x555   :  { %v586_v34 = vsel %vm202_vm4, %v580_v33, -inf }
 0x556   :  { %587 = vmax.xlane.f32.xlu1 %v586_v34  ;;  %v1781_v35 = vpop.f32.mrf.mxu0 }
 0x557   :  { %v106_v35 = vadd.f32 %v2064_v37, %v2046_v25 }
 0x558   :  { %v583_v36 = vpop.f32.mrf.mxu0 }
 0x559   :  { %v2177_v36 = vpack.c.bf16 %v106_v35, %v106_v35 }
 0x55a   :  { %v1782_v38 = vpop.f32.mrf.mxu0 }
 0x567   :  { %598 = vrot.lane.b32.xlu1 %v2049_v31, %s1969_s8 }
 0x5df   :  { %v588_v39 = vpop.xlane.xlu1 %587 }
 0x5e0   :  { %v589_v40 = vsub.f32 %v580_v33, %v588_v39 }
 0x5e2   :  { %v590_v41 = vmul.f32 1.442695, %v589_v40 }
 0x5e3   :  { %v599_v42 = vpop.permute.xlu1 %598 }
 0x5e4   :  { %1916 = vpow2.f32 %v590_v41  ;;  %v604_v43 = vsel %vm218_vm3, %v599_v42, 0  ;;  %v995_v41 = vsel %vm218_vm3, %v2177_v36, 0 }
 0x5e5   :  { %1784 = vmatpush3.bf16.msra.mxu1 %v604_v43 }
 0x5e6   :  { %1795 = vmatprep.subr.bf16.mxu1 %v1966_v21 }
 0x5f1   :  { %v1917_v44 = vpop.eup %1916 }
 0x5f2   :  { %v592_v45 = vsel %vm202_vm4, %v1917_v44, 0.0 }
 0x5f3   :  { %593 = vadd.xlane.f32.xlu1 %v592_v45 }
 0x604   :  { %733 = vrot.lane.b32.xlu1 %v2034_v19, %s1971_s14 }
 0x62d   :  { %700 = vxpose.xlu1.b32.start.end [1/1] (short) (narrow) %v698_v46, 16 }
 0x64f   :  { %899 = vrot.lane.b32.xlu1 %v2032_v18, %s1963_s0 }
 0x67c   :  { %v594_v47 = vpop.xlane.xlu1 %593 }
 0x67d   :  { %1918 = vrcp.f32 %v594_v47 }
 0x680   :  { %v734_v51 = vpop.permute.xlu1 %733 }
 0x68a   :  { %v1919_v48 = vpop.eup %1918 }
 0x68b   :  { %v596_v49 = vmul.f32 %v1919_v48, %v1917_v44 }
 0x68d   :  { %v597_v50 = vpack.c.bf16 %v596_v49, %v596_v49 }
 0x68f   :  { %1786 = vmatmul.mubr.msk.bf16.vlgmr.msra.gmra.mxu1 %vm202_vm4, %v597_v50 }
 0x690   :  { %1797 = vmatprep.mubr.msk.bf16.mxu1 %vm1967_vm1, %v1966_v21 }
 0x6a9   :  { %v716_v52 = vpop.trf.xlu1 }
 0x6ad   :  { %v717_v53 = vpop.trf.xlu1 }
 0x6ae   :  { %v732_v54 = vpack.c.bf16 %v717_v53, %v716_v52 }
 0x6b0   :  { %1796 = vmatpush3.bf16.msra.mxu1 %v732_v54 }
 0x6b1   :  { %1807 = vmatprep.subr.bf16.mxu1 %v1966_v21 }
 0x6b3   :  { %1798 = vmatmul.mubr.msk.bf16.vlgmr.msra.gmra.mxu1 %vm158_vm2, %v734_v51 }
 0x6b4   :  { %1809 = vmatprep.mubr.msk.bf16.mxu1 %vm1967_vm1, %v1966_v21  ;;  %1808 = vmatpush3.bf16.msra.mxu1 %v2155_v17 }
 0x6b5   :  { %1819 = vmatprep.subr.bf16.mxu1 %v1966_v21 }
 0x6c1   :  { %v900_v19 = vpop.permute.xlu1 %899 }
 0x6c2   :  { %902 = vxpose.xlu1.b32.start.end [1/1] (short) (narrow) %v900_v19, 16 }
 0x73e   :  { %v918_v23 = vpop.trf.xlu1 }
 0x742   :  { %v919_v24 = vpop.trf.xlu1 }
 0x74f   :  { %v640_v56 = vpop.f32.mrf.mxu1 }
 0x750   :  { %v646_v57 = vpack.c.bf16 %v640_v56, %v640_v56 }
 0x751   :  { %v1787_v58 = vpop.f32.mrf.mxu1 }
 0x752   :  { %1792 = vmatmul.mubr.msk.bf16.vlgmr.msra.gmra.mxu0 %vm158_vm2, %v646_v57 }
 0x753   :  { %v643_v59 = vpop.f32.mrf.mxu1  ;;  %1803 = vmatprep.mubr.msk.bf16.mxu0 %vm1967_vm1, %v1966_v21 }
 0x755   :  { %v1788_v60 = vpop.f32.mrf.mxu1 }
 0x773   :  { %v772_v61 = vpop.f32.mrf.mxu1 }
 0x774   :  { %v778_v62 = vsel %vm202_vm4, %v772_v61, -inf }
 0x775   :  { %779 = vmax.xlane.f32.xlu0 %v778_v62  ;;  %v1799_v63 = vpop.f32.mrf.mxu1 }
 0x777   :  { %v775_v0 = vpop.f32.mrf.mxu1 }
 0x779   :  { %v1800_v1 = vpop.f32.mrf.mxu1 }
 0x78b   :  { %1038 = vrot.lane.b32.xlu0 %v2032_v18, %s1964_s6 }
 0x7fe   :  { %v780_v2 = vpop.xlane.xlu0 %779 }
 0x7ff   :  { %v781_v5 = vsub.f32 %v772_v61, %v780_v2  ;;  %v2194_v61 = vld [vmem:[%s2265_s4] ss:$0 sm:$0xff]  ;;  %s1972_s4 = smov [#allocation2]  }
 0x800   :  { %s1648_s20 = sshll.u32 %s1972_s4, 4  ;;  %s1649_s20 = int_to_ptr.vmem [resolvable:$true] %s1648_s20 }
 0x801   :  { %v782_v6 = vmul.f32 1.442695, %v781_v5  ;;  %s1940_s21 = scalar_lea.vmem %s1649_s20, 256  ;;  %p1945_p1 = scmp.lt.s32.totalorder %s1649_s20, %s1649_s20 }
 0x802   :  { %v1039_v16 = vpop.permute.xlu0 %1038  ;;  %p1941_p0 = scmp.ne.s32.totalorder %s1649_s20, %s1940_s21  ;;  %p1946_p2 = scmp.lt.s32.totalorder %s1940_s21, %s1940_s21 }
 0x803   :  { %1920 = vpow2.f32 %v782_v6 }
 0x804   :  { %p1947_p3 = por %p1946_p2, %p1945_p1 }
 0x806   :  { %p1948_p4 = pnand %p1947_p3, %p1941_p0 }
 0x810   :  { %v1921_v7 = vpop.eup %1920 }
 0x811   :  { %v784_v8 = vsel %vm202_vm4, %v1921_v7, 0.0 }
 0x812   :  { %785 = vadd.xlane.f32.xlu0 %v784_v8  ;;  %v690_v9 = vpop.f32.mrf.mxu0 }
 0x813   :  { %v2143_v10 = vadd.f32 %v690_v9, %v2109_v28  ;;  %v934_v28 = vpack.c.bf16 %v919_v24, %v918_v23 }
 0x814   :  { %v1793_v11 = vpop.f32.mrf.mxu0 }
 0x816   :  { %v693_v12 = vpop.f32.mrf.mxu0 }
 0x818   :  { %v1794_v13 = vpop.f32.mrf.mxu0 }
 0x828   :  { %790 = vrot.lane.b32.xlu0 %v2049_v31, %s1971_s14 }
 0x82c   :  { %1075 = vrot.lane.b32.xlu0 %v2148_v15, %s1965_s2 }
 0x84a   :  { %1041 = vxpose.xlu0.b32.start.end [1/1] (short) (narrow) %v1039_v16, 16 }
 0x89b   :  { %v786_v20 = vpop.xlane.xlu0 %785 }
 0x89c   :  { %1922 = vrcp.f32 %v786_v20 }
 0x89f   :  { %v791_v22 = vpop.permute.xlu0 %790 }
 0x8a0   :  { %v796_v31 = vsel %vm218_vm3, %v791_v22, 0 }
 0x8a1   :  { %1802 = vmatpush3.bf16.msra.mxu0 %v796_v31 }
 0x8a2   :  { %1813 = vmatprep.subr.bf16.mxu0 %v1966_v21 }
 0x8a3   :  { %v1076_v30 = vpop.permute.xlu0 %1075 }
 0x8a9   :  { %v1923_v26 = vpop.eup %1922 }
 0x8aa   :  { %v788_v27 = vmul.f32 %v1923_v26, %v1921_v7 }
 0x8ac   :  { %v789_v29 = vpack.c.bf16 %v788_v27, %v788_v27 }
 0x8ae   :  { %1804 = vmatmul.mubr.msk.bf16.vlgmr.msra.gmra.mxu0 %vm202_vm4, %v789_v29 }
 0x8af   :  { %1814 = vmatpush3.bf16.msra.mxu0 %v934_v28  ;;  %1815 = vmatprep.mubr.msk.bf16.mxu0 %vm1967_vm1, %v1966_v21 }
 0x8b0   :  { %1825 = vmatprep.subr.bf16.mxu0 %v1966_v21 }
 0x8b6   :  { %1816 = vmatmul.mubr.msk.bf16.vlgmr.msra.gmra.mxu0 %vm158_vm2, %v2148_v15 }
 0x8b7   :  { %1827 = vmatprep.mubr.msk.bf16.mxu0 %vm1967_vm1, %v1966_v21 }
 0x8c6   :  { %v1057_v32 = vpop.trf.xlu0 }
 0x8ca   :  { %v1058_v33 = vpop.trf.xlu0 }
 0x8cb   :  { %v1073_v34 = vpack.c.bf16 %v1058_v33, %v1057_v32 }
 0x8cd   :  { %1826 = vmatpush3.bf16.msra.mxu0 %v1073_v34 }
 0x8ce   :  { %1837 = vmatprep.subr.bf16.mxu0 %v1966_v21 }
 0x8d0   :  { %1828 = vmatmul.mubr.msk.bf16.vlgmr.msra.gmra.mxu0 %vm158_vm2, %v1076_v30 }
 0x8d1   :  { %1838 = vmatpush3.bf16.msra.mxu0 %v2095_v4  ;;  %1839 = vmatprep.mubr.msk.bf16.mxu0 %vm1967_vm1, %v1966_v21 }
 0x8d2   :  { %1849 = vmatprep.subr.bf16.mxu0 %v1966_v21 }
 0x96e   :  { %v832_v38 = vpop.f32.mrf.mxu0 }
 0x96f   :  { %v838_v39 = vpack.c.bf16 %v832_v38, %v832_v38 }
 0x970   :  { %v1805_v40 = vpop.f32.mrf.mxu0 }
 0x971   :  { %1810 = vmatmul.mubr.msk.bf16.vlgmr.msra.gmra.mxu1 %vm158_vm2, %v838_v39 }
 0x972   :  { %1820 = vmatpush3.bf16.msra.mxu1 %v995_v41  ;;  %v835_v4 = vpop.f32.mrf.mxu0  ;;  %1821 = vmatprep.mubr.msk.bf16.mxu1 %vm1967_vm1, %v1966_v21 }
 0x973   :  { %1831 = vmatprep.subr.bf16.mxu1 %v1966_v21 }
 0x974   :  { %v1806_v42 = vpop.f32.mrf.mxu0 }
 0x976   :  { %v973_v43 = vpop.f32.mrf.mxu0 }
 0x977   :  { %v979_v25 = vsel %vm202_vm4, %v973_v43, -inf }
 0x978   :  { %980 = vmax.xlane.f32.xlu0 %v979_v25  ;;  %v1817_v37 = vpop.f32.mrf.mxu0 }
 0x97a   :  { %v976_v44 = vpop.f32.mrf.mxu0 }
 0x97c   :  { %v1818_v45 = vpop.f32.mrf.mxu0 }
 0x990   :  { %v1114_v46 = vpop.f32.mrf.mxu0 }
 0x991   :  { %v1120_v47 = vsel %vm202_vm4, %v1114_v46, -inf }
 0x992   :  { %1121 = vmax.xlane.f32.xlu1 %v1120_v47  ;;  %v1829_v48 = vpop.f32.mrf.mxu0 }
 0x994   :  { %v1117_v49 = vpop.f32.mrf.mxu0 }
 0x996   :  { %v1830_v50 = vpop.f32.mrf.mxu0 }
 0xa01   :  { %v981_v51 = vpop.xlane.xlu0 %980 }
 0xa02   :  { %v982_v52 = vsub.f32 %v973_v43, %v981_v51 }
 0xa04   :  { %v983_v53 = vmul.f32 1.442695, %v982_v52 }
 0xa06   :  { %1924 = vpow2.f32 %v983_v53 }
 0xa13   :  { %v1925_v54 = vpop.eup %1924 }
 0xa14   :  { %v985_v19 = vsel %vm202_vm4, %v1925_v54, 0.0 }
 0xa15   :  { %986 = vadd.xlane.f32.xlu0 %v985_v19 }
 0xa1b   :  { %v1122_v56 = vpop.xlane.xlu1 %1121 }
 0xa1c   :  { %v1123_v57 = vsub.f32 %v1114_v46, %v1122_v56 }
 0xa1e   :  { %v1124_v58 = vmul.f32 1.442695, %v1123_v57 }
 0xa20   :  { %1926 = vpow2.f32 %v1124_v58 }
 0xa2b   :  { %1133 = vrot.lane.b32.xlu0 %v2177_v36, %s1965_s2 }
 0xa2d   :  { %v1927_v59 = vpop.eup %1926 }
 0xa2e   :  { %v1126_v60 = vsel %vm202_vm4, %v1927_v59, 0.0 }
 0xa2f   :  { %1127 = vadd.xlane.f32.xlu1 %v1126_v60 }
 0xa31   :  { %v882_v62 = vpop.f32.mrf.mxu1 }
 0xa32   :  { %v888_v63 = vadd.f32 %v882_v62, %v2143_v10 }
 0xa33   :  { %v1811_v0 = vpop.f32.mrf.mxu1 }
 0xa34   :  { %v895_v1 = vadd.f32 %v2194_v61, %v888_v63 }
 0xa35   :  { %v885_v2 = vpop.f32.mrf.mxu1 }
 0xa36   :  { %896 = vst.msk [vmem:[#allocation2] sm:$0xff] %vm61_vm0, %v895_v1 }
 0xa37   :  { %v1812_v5 = vpop.f32.mrf.mxu1 }
 0xa40   :  { %1268 = vrot.lane.b32.xlu1 %v2032_v18, %s1968_s7 }
 0xa44   :  { %1304 = vrot.lane.b32.xlu1 %v2148_v15, %s1969_s8 }
 0xa9e   :  { %v987_v6 = vpop.xlane.xlu0 %986 }
 0xa9f   :  { %1928 = vrcp.f32 %v987_v6 }
 0xaa2   :  { %v1134_v9 = vpop.permute.xlu0 %1133 }
 0xaa3   :  { %v1139_v10 = vsel %vm218_vm3, %v1134_v9, 0 }
 0xaac   :  { %v1929_v7 = vpop.eup %1928 }
 0xaad   :  { %v989_v8 = vmul.f32 %v1929_v7, %v1925_v54 }
 0xaaf   :  { %v990_v11 = vpack.c.bf16 %v989_v8, %v989_v8 }
 0xab1   :  { %1822 = vmatmul.mubr.msk.bf16.vlgmr.msra.gmra.mxu1 %vm202_vm4, %v990_v11 }
 0xab2   :  { %1832 = vmatpush3.bf16.msra.mxu1 %v1139_v10  ;;  %1833 = vmatprep.mubr.msk.bf16.mxu1 %vm1967_vm1, %v1966_v21 }
 0xab3   :  { %1843 = vmatprep.subr.bf16.mxu1 %v1966_v21 }
 0xab8   :  { %v1128_v12 = vpop.xlane.xlu1 %1127 }
 0xab9   :  { %1930 = vrcp.f32 %v1128_v12 }
 0xabc   :  { %v1269_v13 = vpop.permute.xlu1 %1268 }
 0xabd   :  { %1271 = vxpose.xlu0.b32.start.end [1/1] (short) (narrow) %v1269_v13, 16 }
 0xac0   :  { %v1305_v34 = vpop.permute.xlu1 %1304 }
 0xac6   :  { %v1931_v14 = vpop.eup %1930 }
 0xac7   :  { %v1130_v16 = vmul.f32 %v1931_v14, %v1927_v59 }
 0xac9   :  { %v1131_v20 = vpack.c.bf16 %v1130_v16, %v1130_v16 }
 0xacb   :  { %1834 = vmatmul.mubr.msk.bf16.vlgmr.msra.gmra.mxu1 %vm202_vm4, %v1131_v20 }
 0xacc   :  { %1844 = vmatpush3.bf16.msra.mxu1 %v2088_v3  ;;  %1845 = vmatprep.mubr.msk.bf16.mxu1 %vm1967_vm1, %v1966_v21 }
 0xacd   :  { %1855 = vmatprep.subr.bf16.mxu1 %v1966_v21 }
 0xaea   :  { %1454 = vrot.lane.b32.xlu0 %v2032_v18, %s1970_s9 }
 0xb39   :  { %v1287_v27 = vpop.trf.xlu0 }
 0xb3d   :  { %v1288_v3 = vpop.trf.xlu0 }
 0xb3e   :  { %v1303_v28 = vpack.c.bf16 %v1288_v3, %v1287_v27 }
 0xb5c   :  { %v1455_v54 = vpop.permute.xlu0 %1454 }
 0xb71   :  { %v1031_v22 = vpop.f32.mrf.mxu1 }
 0xb72   :  { %v1037_v31 = vpack.c.bf16 %v1031_v22, %v1031_v22 }
 0xb73   :  { %v1823_v23 = vpop.f32.mrf.mxu1 }
 0xb74   :  { %1846 = vmatmul.mubr.msk.bf16.vlgmr.msra.gmra.mxu1 %vm158_vm2, %v1037_v31 }
 0xb75   :  { %v1034_v24 = vpop.f32.mrf.mxu1  ;;  %1857 = vmatprep.mubr.msk.bf16.mxu1 %vm1967_vm1, %v1966_v21 }
 0xb77   :  { %v1824_v26 = vpop.f32.mrf.mxu1 }
 0xb8b   :  { %v1175_v29 = vpop.f32.mrf.mxu1 }
 0xb8c   :  { %v1181_v30 = vpack.c.bf16 %v1175_v29, %v1175_v29 }
 0xb8d   :  { %v1835_v32 = vpop.f32.mrf.mxu1 }
 0xb8e   :  { %1840 = vmatmul.mubr.msk.bf16.vlgmr.msra.gmra.mxu0 %vm158_vm2, %v1181_v30 }
 0xb8f   :  { %v1178_v33 = vpop.f32.mrf.mxu1  ;;  %1850 = vmatpush3.bf16.msra.mxu0 %v1303_v28  ;;  %1851 = vmatprep.mubr.msk.bf16.mxu0 %vm1967_vm1, %v1966_v21 }
 0xb90   :  { %1861 = vmatprep.subr.bf16.mxu0 %v1966_v21 }
 0xb91   :  { %v1836_v18 = vpop.f32.mrf.mxu1 }
 0xb96   :  { %1852 = vmatmul.mubr.msk.bf16.vlgmr.msra.gmra.mxu0 %vm158_vm2, %v1305_v34 }
 0xb97   :  { %1862 = vmatpush3.bf16.msra.mxu0 %v2131_v55  ;;  %1863 = vmatprep.mubr.msk.bf16.mxu0 %vm1967_vm1, %v1966_v21 }
 0xb98   :  { %1873 = vmatprep.subr.bf16.mxu0 %v1966_v21 }
 0xc34   :  { %v1262_v35 = vpop.f32.mrf.mxu1 }
 0xc36   :  { %v1847_v38 = vpop.f32.mrf.mxu1 }
 0xc38   :  { %v1265_v39 = vpop.f32.mrf.mxu1 }
 0xc3a   :  { %v1848_v40 = vpop.f32.mrf.mxu1 }
 0xc4e   :  { %v1219_v41 = vpop.f32.mrf.mxu0 }
 0xc4f   :  { %v2227_v4 = vadd.f32 %v1262_v35, %v1219_v41 }
 0xc50   :  { %v1841_v42 = vpop.f32.mrf.mxu0 }
 0xc52   :  { %v1222_v43 = vpop.f32.mrf.mxu0 }
 0xc54   :  { %v1842_v25 = vpop.f32.mrf.mxu0 }
 0xc56   :  { %v1343_v37 = vpop.f32.mrf.mxu0 }
 0xc57   :  { %v1349_v44 = vsel %vm202_vm4, %v1343_v37, -inf }
 0xc58   :  { %1350 = vmax.xlane.f32.xlu1 %v1349_v44  ;;  %v1853_v55 = vpop.f32.mrf.mxu0 }
 0xc5a   :  { %v1346_v45 = vpop.f32.mrf.mxu0 }
 0xc5c   :  { %v1854_v46 = vpop.f32.mrf.mxu0 }
 0xc69   :  { %1361 = vrot.lane.b32.xlu1 %v2177_v36, %s1969_s8 }
 0xce1   :  { %v1351_v47 = vpop.xlane.xlu1 %1350 }
 0xce2   :  { %v1352_v48 = vsub.f32 %v1343_v37, %v1351_v47 }
 0xce4   :  { %v1353_v49 = vmul.f32 1.442695, %v1352_v48 }
 0xce5   :  { %v1362_v50 = vpop.permute.xlu1 %1361 }
 0xce6   :  { %1932 = vpow2.f32 %v1353_v49  ;;  %v1367_v51 = vsel %vm218_vm3, %v1362_v50, 0 }
 0xce7   :  { %1856 = vmatpush3.bf16.msra.mxu1 %v1367_v51 }
 0xce8   :  { %1867 = vmatprep.subr.bf16.mxu1 %v1966_v21 }
 0xcf3   :  { %v1933_v52 = vpop.eup %1932 }
 0xcf4   :  { %v1355_v53 = vsel %vm202_vm4, %v1933_v52, 0.0 }
 0xcf5   :  { %1356 = vadd.xlane.f32.xlu1 %v1355_v53 }
 0xd06   :  { %1490 = vrot.lane.b32.xlu1 %v2148_v15, %s1971_s14 }
 0xd2f   :  { %1457 = vxpose.xlu1.b32.start.end [1/1] (short) (narrow) %v1455_v54, 16 }
 0xd7e   :  { %v1357_v19 = vpop.xlane.xlu1 %1356 }
 0xd7f   :  { %1934 = vrcp.f32 %v1357_v19 }
 0xd82   :  { %v1491_v59 = vpop.permute.xlu1 %1490 }
 0xd8c   :  { %v1935_v56 = vpop.eup %1934 }
 0xd8d   :  { %v1359_v57 = vmul.f32 %v1935_v56, %v1933_v52 }
 0xd8f   :  { %v1360_v58 = vpack.c.bf16 %v1359_v57, %v1359_v57 }
 0xd91   :  { %1858 = vmatmul.mubr.msk.bf16.vlgmr.msra.gmra.mxu1 %vm202_vm4, %v1360_v58 }
 0xd92   :  { %1869 = vmatprep.mubr.msk.bf16.mxu1 %vm1967_vm1, %v1966_v21 }
 0xdab   :  { %v1473_v60 = vpop.trf.xlu1 }
 0xdaf   :  { %v1474_v62 = vpop.trf.xlu1 }
 0xdb0   :  { %v1489_v63 = vpack.c.bf16 %v1474_v62, %v1473_v60 }
 0xdb2   :  { %1868 = vmatpush3.bf16.msra.mxu1 %v1489_v63 }
 0xdb3   :  { %1879 = vmatprep.subr.bf16.mxu1 %v1966_v21 }
 0xdb5   :  { %1870 = vmatmul.mubr.msk.bf16.vlgmr.msra.gmra.mxu1 %vm158_vm2, %v1491_v59 }
 0xdb6   :  { %1880 = vmatpush3.bf16.msra.mxu1 %v2155_v17  ;;  %1881 = vmatprep.mubr.msk.bf16.mxu1 %vm1967_vm1, %v1966_v21 }
 0xe51   :  { %v1403_v15 = vpop.f32.mrf.mxu1 }
 0xe52   :  { %v1409_v0 = vpack.c.bf16 %v1403_v15, %v1403_v15 }
 0xe53   :  { %v1859_v1 = vpop.f32.mrf.mxu1 }
 0xe54   :  { %1864 = vmatmul.mubr.msk.bf16.vlgmr.msra.gmra.mxu0 %vm158_vm2, %v1409_v0 }
 0xe55   :  { %v1406_v2 = vpop.f32.mrf.mxu1  ;;  %1875 = vmatprep.mubr.msk.bf16.mxu0 %vm1967_vm1, %v1966_v21 }
 0xe57   :  { %v1860_v5 = vpop.f32.mrf.mxu1 }
 0xe75   :  { %v1529_v6 = vpop.f32.mrf.mxu1 }
 0xe76   :  { %v1535_v7 = vsel %vm202_vm4, %v1529_v6, -inf }
 0xe77   :  { %1536 = vmax.xlane.f32.xlu0 %v1535_v7  ;;  %v1871_v8 = vpop.f32.mrf.mxu1 }
 0xe79   :  { %v1532_v9 = vpop.f32.mrf.mxu1 }
 0xe7b   :  { %v1872_v17 = vpop.f32.mrf.mxu1 }
 0xe8d   :  { %1547 = vrot.lane.b32.xlu0 %v2177_v36, %s1971_s14 }
 0xf00   :  { %v1537_v11 = vpop.xlane.xlu0 %1536 }
 0xf01   :  { %v1538_v10 = vsub.f32 %v1529_v6, %v1537_v11 }
 0xf03   :  { %v1539_v12 = vmul.f32 1.442695, %v1538_v10 }
 0xf04   :  { %v1548_v13 = vpop.permute.xlu0 %1547 }
 0xf05   :  { %1936 = vpow2.f32 %v1539_v12  ;;  %v1553_v14 = vsel %vm218_vm3, %v1548_v13, 0 }
 0xf06   :  { %1874 = vmatpush3.bf16.msra.mxu0 %v1553_v14 }
 0xf12   :  { %v1937_v21 = vpop.eup %1936 }
 0xf13   :  { %v1541_v16 = vsel %vm202_vm4, %v1937_v21, 0.0 }
 0xf14   :  { %1542 = vadd.xlane.f32.xlu1 %v1541_v16  ;;  %v1447_v20 = vpop.f32.mrf.mxu0 }
 0xf15   :  { %v1453_v22 = vadd.f32 %v1447_v20, %v2227_v4 }
 0xf16   :  { %v1865_v31 = vpop.f32.mrf.mxu0 }
 0xf18   :  { %v1450_v23 = vpop.f32.mrf.mxu0 }
 0xf1a   :  { %v1866_v24 = vpop.f32.mrf.mxu0 }
 0xf9d   :  { %v1543_v26 = vpop.xlane.xlu1 %1542 }
 0xf9e   :  { %1938 = vrcp.f32 %v1543_v26 }
 0xfab   :  { %v1939_v36 = vpop.eup %1938 }
 0xfac   :  { %v1545_v27 = vmul.f32 %v1939_v36, %v1937_v21 }
 0xfae   :  { %v1546_v3 = vpack.c.bf16 %v1545_v27, %v1545_v27 }
 0xfb0   :  { %1876 = vmatmul.mubr.msk.bf16.vlgmr.msra.gmra.mxu0 %vm202_vm4, %v1546_v3 }
0x1070   :  { %v1589_v28 = vpop.f32.mrf.mxu0 }
0x1071   :  { %v1595_v29 = vpack.c.bf16 %v1589_v28, %v1589_v28 }
0x1072   :  { %v1877_v30 = vpop.f32.mrf.mxu0 }
0x1073   :  { %1882 = vmatmul.mubr.msk.bf16.vlgmr.msra.gmra.mxu1 %vm158_vm2, %v1595_v29 }
0x1074   :  { %v1592_v32 = vpop.f32.mrf.mxu0 }
0x1076   :  { %v1878_v33 = vpop.f32.mrf.mxu0 }
0x1133   :  { %v1633_v18 = vpop.f32.mrf.mxu1 }
0x1134   :  { %v1639_v34 = vadd.f32 %v1633_v18, %v1453_v22 }
0x1135   :  { %v1883_v35 = vpop.f32.mrf.mxu1 }
0x1136   :  { %v1640_v38 = vadd.f32 %v2194_v61, %v1639_v34 }
0x1137   :  { %v1636_v39 = vpop.f32.mrf.mxu1 }
0x1138   :  { %1642 = vst.msk [vmem:[#allocation2 + $0x8] sm:$0xff] %vm61_vm0, %v1640_v38 }
0x1139   :  { %v1884_v40 = vpop.f32.mrf.mxu1 }
0x113a   :  { %1951 = shalt.err (!%p1948_p4)
}
0x113b   :  { %s1973_s22 = smov 128   ;;  %s1974_s23 = smov 8  }
0x113c   :  { %1654 = dma.vmem_to_hbm [thread:$0]  %s1649_s20, 256, %s2266_s5, [#allocation3], %s1973_s22, %s1973_s22, %s1974_s23  }
0x113d   :  { %1960 = dma.done.wait [#allocation3], 256  }
0x113e   :  { %1961 = vsyncadd [#allocation3], 4294967040 }
0x113f   :  { %1658 = vsyncpa [#allocation3], 1 }

</bundles_post_ra>
